<compile_context>
chip_gen: v5e
topology: v5e:2x2
jax: 0.10.0
libtpu: 0.0.40
codegen_flags: <defaults>
</compile_context>

<pallas_src>
import functools

import jax
import jax.numpy as jnp
from jax.experimental import pallas as pl
from jax.experimental.pallas import tpu as pltpu


_LANE = 128          # lane (minor) axis width
_SUBLANE = 8         # f32 sublane tile
_TM_MAX = 2048       # max tile rows -> 1 MiB f32 input block (sweep 2048-4096)
_MIN_PALLAS_BATCH = 8192   # below this, plain jnp is faster than a kernel launch


def _round_up(x, m):
    return ((x + m - 1) // m) * m


def _focal_loss_jnp(inputs, targets, alpha, gamma, eps):
    """Reference / small-batch fallback (matches the torch module exactly)."""
    p = jnp.clip(inputs.astype(jnp.float32), eps, 1.0 - eps)
    t = targets.astype(jnp.float32)
    bce = -(t * jnp.log(p) + (1.0 - t) * jnp.log(1.0 - p))
    p_t = p * t + (1.0 - p) * (1.0 - t)
    focal_w = (1.0 - p_t) ** gamma
    alpha_w = alpha * t + (1.0 - alpha) * (1.0 - t)
    return jnp.mean(alpha_w * focal_w * bce)


def _focal_loss_kernel(inp_ref, tgt_ref, out_ref, *,
                       alpha, gamma, eps, batch, tm, tiles_per_split,
                       hard_labels, emit_mask):
    c = pl.program_id(0)   # split index ("parallel": one per TC on v7x)
    i = pl.program_id(1)   # streamed reduction tile ("arbitrary")

    @pl.when(i == 0)
    def _init():
        out_ref[...] = jnp.zeros_like(out_ref)

    # native-dtype loads, upcast in-kernel (halves HBM read traffic for bf16)
    p = inp_ref[...].astype(jnp.float32)       # (tm, 128)
    t = tgt_ref[...].astype(jnp.float32)

    # torch.clamp(inputs, eps, 1 - eps)
    p = jnp.clip(p, eps, 1.0 - eps)

    # p_t = p*t + (1-p)*(1-t)
    p_t = p * t + (1.0 - p) * (1.0 - t)
    one_m_pt = 1.0 - p_t

    if hard_labels:
        # exact for t in {0,1}: BCE == -log(p_t); 1 EUP log/elem instead of 2
        bce = -jnp.log(p_t)
    else:
        # two-log form: exact for soft labels (matches F.binary_cross_entropy)
        bce = -(t * jnp.log(p) + (1.0 - t) * jnp.log(1.0 - p))

    # (1 - p_t)^gamma : repeated multiply for small integer gamma
    # (general pow lowers to exp(gamma*log(x)) = 2 EUP transcendentals/elem)
    g = float(gamma)
    if g.is_integer() and 0.0 <= g <= 8.0:
        gi = int(g)
        if gi == 0:
            focal_w = jnp.ones_like(one_m_pt)
        else:
            focal_w = one_m_pt
            for _ in range(gi - 1):
                focal_w = focal_w * one_m_pt
    else:
        focal_w = one_m_pt ** gamma

    alpha_w = alpha * t + (1.0 - alpha) * (1.0 - t)
    loss = alpha_w * focal_w * bce                      # (tm, 128) f32

    def _accumulate(vals):
        # elementwise partial-sum into the resident (8,128) output block:
        # pure VPU adds under the DMA, no cross-lane XLU reduce per tile.
        # TODO(synk): widen to a (32,128) scratch if profiling at tm>=2048
        # ever shows this add chain exposed (v7x, VALU/latency-bound case).
        out_ref[...] += jnp.sum(
            vals.reshape(tm // _SUBLANE, _SUBLANE, _LANE), axis=0)

    if not emit_mask:
        # no tile can see padded / out-of-bounds lanes: plain path only
        _accumulate(loss)
    else:
        blk = c * tiles_per_split + i          # logical tile index
        full_rows = batch // _LANE             # fully-valid (rows,128) rows
        rem = batch - full_rows * _LANE        # valid lanes in boundary row

        # only the tile touching the batch boundary (and any duplicated
        # trailing tile) pays for the iota / compare / where.
        needs_mask = (blk + 1) * tm > full_rows

        @pl.when(needs_mask)
        def _masked():
            row = blk * tm + jax.lax.broadcasted_iota(jnp.int32, (tm, _LANE), 0)
            col = jax.lax.broadcasted_iota(jnp.int32, (tm, _LANE), 1)
            valid = (row < full_rows) | ((row == full_rows) & (col < rem))
            _accumulate(jnp.where(valid, loss, 0.0))

        @pl.when(jnp.logical_not(needs_mask))
        def _full():
            _accumulate(loss)


def focal_loss(inputs, targets, alpha=0.25, gamma=2.0, eps=1e-6,
               hard_labels=False, min_pallas_batch=_MIN_PALLAS_BATCH):
    """inputs, targets: [batch] -> scalar f32 focal loss (mean reduction).

    `hard_labels=True` enables the single-log BCE fast path (exact when
    targets are strictly 0/1).  Batches below `min_pallas_batch` use a plain
    jnp fallback (kernel launch overhead dominates there).
    """
    assert inputs.shape == targets.shape and inputs.ndim == 1
    batch = inputs.shape[0]

    if batch < min_pallas_batch:
        return _focal_loss_jnp(inputs, targets, alpha, gamma, eps)

    itemsize = min(jnp.dtype(inputs.dtype).itemsize,
                   jnp.dtype(targets.dtype).itemsize)
    pack = max(_SUBLANE, 32 // max(itemsize, 1))   # 8 f32 / 16 bf16 / 32 int8

    rows = pl.cdiv(batch, _LANE)                   # logical rows of 128 elems

    # 2-way split only when each half still gets >= one full _TM_MAX tile
    # (both TensorCores on v7x; on single-TC v5e/v6e a split for smaller
    # batches would only add loop / init / padding overhead).
    num_splits = 2 if rows >= 2 * _TM_MAX else 1

    if rows >= _TM_MAX:
        tm = _TM_MAX
        rows_arr = rows            # partial trailing block handles ragged end
    else:
        tm = _round_up(rows, pack)
        rows_arr = tm              # single block == whole (minimally padded) array

    # minimal padding: only up to the next multiple of 128 (plus sublane
    # rounding for the single-tile small case); zero pad when already aligned.
    padded_len = rows_arr * _LANE
    inp, tgt = inputs, targets
    if padded_len != batch:
        inp = jnp.pad(inp, (0, padded_len - batch))
        tgt = jnp.pad(tgt, (0, padded_len - batch))
    inp2d = inp.reshape(rows_arr, _LANE)           # reshape is a bitcast, no copy
    tgt2d = tgt.reshape(rows_arr, _LANE)

    total_tiles = pl.cdiv(rows_arr, tm)
    tiles_per_split = pl.cdiv(total_tiles, num_splits)

    # emit the mask branch only if some tile can see padded / garbage lanes
    emit_mask = (total_tiles * tm * _LANE != batch) or \
                (num_splits * tiles_per_split != total_tiles)

    kernel = functools.partial(
        _focal_loss_kernel,
        alpha=float(alpha), gamma=float(gamma), eps=float(eps),
        batch=batch, tm=tm, tiles_per_split=tiles_per_split,
        hard_labels=bool(hard_labels), emit_mask=emit_mask)

    last_blk = total_tiles - 1
    if num_splits * tiles_per_split == total_tiles:
        in_idx = lambda c, i: (c * tiles_per_split + i, 0)
    else:
        # a possible out-of-range logical block of the second split re-reads
        # the last real block; its contribution is zeroed by the in-kernel mask.
        in_idx = lambda c, i: (jnp.minimum(c * tiles_per_split + i, last_blk), 0)

    in_spec = pl.BlockSpec((tm, _LANE), in_idx)
    out_spec = pl.BlockSpec((_SUBLANE, _LANE), lambda c, i: (c, 0))

    partials = pl.pallas_call(
        kernel,
        out_shape=jax.ShapeDtypeStruct((num_splits * _SUBLANE, _LANE),
                                       jnp.float32),
        grid_spec=pltpu.PrefetchScalarGridSpec(
            num_scalar_prefetch=0,
            grid=(num_splits, tiles_per_split),
            in_specs=[in_spec, in_spec],
            out_specs=out_spec),
        compiler_params=pltpu.CompilerParams(
            dimension_semantics=("parallel", "arbitrary")),
        cost_estimate=pl.CostEstimate(
            flops=20 * batch,
            transcendentals=(1 if hard_labels else 2) * batch,
            bytes_accessed=batch * (jnp.dtype(inputs.dtype).itemsize
                                    + jnp.dtype(targets.dtype).itemsize)
                           + num_splits * _SUBLANE * _LANE * 4),
    )(inp2d, tgt2d)

    # single cross-lane reduce + fold-in of 1/batch (multiply, not divide)
    return jnp.sum(partials) * jnp.float32(1.0 / batch)


if __name__ == "__main__":
    key = jax.random.PRNGKey(0)

    def make(k, batch, dtype=jnp.float32):
        k1, k2 = jax.random.split(k)
        inputs = jax.nn.sigmoid(
            jax.random.normal(k1, (batch,), dtype=jnp.float32)).astype(dtype)
        targets = jax.random.bernoulli(
            k2, p=0.5, shape=(batch,)).astype(dtype)
        return inputs, targets

    k0, k1, k2, k3 = jax.random.split(key, 4)

    # 1) module-spec small shape (batch=8), forced through the Pallas kernel
    inp, tgt = make(k0, 8)
    loss = focal_loss(inp, tgt, min_pallas_batch=0)
    jax.block_until_ready(loss)
    ref = _focal_loss_jnp(inp, tgt, 0.25, 2.0, 1e-6)
    assert jnp.allclose(loss, ref, atol=1e-5, rtol=1e-5), (loss, ref)

    # 2) non-multiple-of-128 batch: exercises padding + gated tail mask
    inp, tgt = make(k1, 300)
    loss = focal_loss(inp, tgt, min_pallas_batch=0)
    jax.block_until_ready(loss)
    ref = _focal_loss_jnp(inp, tgt, 0.25, 2.0, 1e-6)
    assert jnp.allclose(loss, ref, atol=1e-5, rtol=1e-5), (loss, ref)

    # 3) aligned batch (zero padding, no mask branch emitted) + hard-label path
    inp, tgt = make(k2, 1024)
    loss = focal_loss(inp, tgt, hard_labels=True, min_pallas_batch=0)
    jax.block_until_ready(loss)
    ref = _focal_loss_jnp(inp, tgt, 0.25, 2.0, 1e-6)
    assert jnp.allclose(loss, ref, atol=1e-5, rtol=1e-5), (loss, ref)

    # 4) bf16 inputs: native-dtype stream, in-kernel upcast
    inp_bf, tgt_bf = make(k3, 384, jnp.bfloat16)
    loss = focal_loss(inp_bf, tgt_bf, min_pallas_batch=0)
    jax.block_until_ready(loss)
    ref = _focal_loss_jnp(inp_bf, tgt_bf, 0.25, 2.0, 1e-6)
    assert jnp.allclose(loss, ref, atol=1e-5, rtol=1e-5), (loss, ref)

    # 5) default small-batch path (plain-jnp fallback, no kernel launch)
    inp, tgt = make(k0, 8)
    loss = focal_loss(inp, tgt)
    jax.block_until_ready(loss)
    ref = _focal_loss_jnp(inp, tgt, 0.25, 2.0, 1e-6)
    assert jnp.allclose(loss, ref, atol=1e-5, rtol=1e-5), (loss, ref)

    print("KERNEL_OK")
</pallas_src>

<mosaic_0001>
module attributes {stable_mosaic.version = 11 : i64} {
  func.func @_focal_loss_kernel(%arg0: i32, %arg1: i32, %arg2: memref<8x128xf32, #tpu.memory_space<vmem>>, %arg3: memref<8x128xf32, #tpu.memory_space<vmem>>, %arg4: memref<8x128xf32, #tpu.memory_space<vmem>>) attributes {dimension_semantics = [#tpu.dimension_semantics<parallel>, #tpu.dimension_semantics<arbitrary>], iteration_bounds = array<i64: 1, 1>, scalar_prefetch = 0 : i64, scratch_operands = 0 : i64, tpu.core_type = #tpu.core_type<tc>, window_params = [{transform_indices = @transform_0, window_bounds = array<i64: 8, 128>}, {transform_indices = @transform_1, window_bounds = array<i64: 8, 128>}, {transform_indices = @transform_2, window_bounds = array<i64: 8, 128>}]} {
    %c0_i32 = arith.constant 0 : i32
    %0 = arith.cmpi eq, %arg1, %c0_i32 : i32
    %1 = arith.extui %0 : i1 to i32
    %c0_i32_0 = arith.constant 0 : i32
    %2 = arith.cmpi ne, %1, %c0_i32_0 : i32
    scf.if %2 {
      %cst_18 = arith.constant 0.000000e+00 : f32
      %49 = vector.broadcast %cst_18 : f32 to vector<8x128xf32>
      %c0_19 = arith.constant 0 : index
      %c0_20 = arith.constant 0 : index
      %50 = vector.load %arg4[%c0_19, %c0_20] : memref<8x128xf32, #tpu.memory_space<vmem>>, vector<8x128xf32>
      tpu.vector_store %arg4[%c0_19, %c0_20], %49 {strides = array<i32>} : memref<8x128xf32, #tpu.memory_space<vmem>>, vector<8x128xf32>,
    } else {
    }
    %c0 = arith.constant 0 : index
    %c0_1 = arith.constant 0 : index
    %3 = vector.load %arg2[%c0, %c0_1] : memref<8x128xf32, #tpu.memory_space<vmem>>, vector<8x128xf32>
    %c0_2 = arith.constant 0 : index
    %c0_3 = arith.constant 0 : index
    %4 = vector.load %arg3[%c0_2, %c0_3] : memref<8x128xf32, #tpu.memory_space<vmem>>, vector<8x128xf32>
    %cst = arith.constant 9.99999997E-7 : f32
    %cst_4 = arith.constant 0.999998986 : f32
    %5 = vector.broadcast %cst : f32 to vector<8x128xf32>
    %6 = arith.maximumf %5, %3 : vector<8x128xf32>
    %7 = vector.broadcast %cst_4 : f32 to vector<8x128xf32>
    %8 = arith.minimumf %7, %6 : vector<8x128xf32>
    %9 = arith.mulf %8, %4 : vector<8x128xf32>
    %cst_5 = arith.constant 1.000000e+00 : f32
    %10 = vector.broadcast %cst_5 : f32 to vector<8x128xf32>
    %11 = arith.subf %10, %8 : vector<8x128xf32>
    %cst_6 = arith.constant 1.000000e+00 : f32
    %12 = vector.broadcast %cst_6 : f32 to vector<8x128xf32>
    %13 = arith.subf %12, %4 : vector<8x128xf32>
    %14 = arith.mulf %11, %13 : vector<8x128xf32>
    %15 = arith.addf %9, %14 : vector<8x128xf32>
    %cst_7 = arith.constant 1.000000e+00 : f32
    %16 = vector.broadcast %cst_7 : f32 to vector<8x128xf32>
    %17 = arith.subf %16, %15 : vector<8x128xf32>
    %18 = math.log %8 : vector<8x128xf32>
    %19 = arith.mulf %4, %18 : vector<8x128xf32>
    %cst_8 = arith.constant 1.000000e+00 : f32
    %20 = vector.broadcast %cst_8 : f32 to vector<8x128xf32>
    %21 = arith.subf %20, %4 : vector<8x128xf32>
    %cst_9 = arith.constant 1.000000e+00 : f32
    %22 = vector.broadcast %cst_9 : f32 to vector<8x128xf32>
    %23 = arith.subf %22, %8 : vector<8x128xf32>
    %24 = math.log %23 : vector<8x128xf32>
    %25 = arith.mulf %21, %24 : vector<8x128xf32>
    %26 = arith.addf %19, %25 : vector<8x128xf32>
    %cst_10 = arith.constant 0.000000e+00 : f32
    %27 = vector.broadcast %cst_10 : f32 to vector<8x128xf32>
    %28 = arith.subf %27, %26 : vector<8x128xf32>
    %29 = arith.mulf %17, %17 : vector<8x128xf32>
    %cst_11 = arith.constant 2.500000e-01 : f32
    %30 = vector.broadcast %cst_11 : f32 to vector<8x128xf32>
    %31 = arith.mulf %30, %4 : vector<8x128xf32>
    %cst_12 = arith.constant 1.000000e+00 : f32
    %32 = vector.broadcast %cst_12 : f32 to vector<8x128xf32>
    %33 = arith.subf %32, %4 : vector<8x128xf32>
    %cst_13 = arith.constant 7.500000e-01 : f32
    %34 = vector.broadcast %cst_13 : f32 to vector<8x128xf32>
    %35 = arith.mulf %34, %33 : vector<8x128xf32>
    %36 = arith.addf %31, %35 : vector<8x128xf32>
    %37 = arith.mulf %36, %29 : vector<8x128xf32>
    %38 = arith.mulf %37, %28 : vector<8x128xf32>
    %c1_i32 = arith.constant 1 : i32
    %39 = arith.muli %arg0, %c1_i32 : i32
    %40 = arith.addi %39, %arg1 : i32
    %c1_i32_14 = arith.constant 1 : i32
    %41 = arith.addi %40, %c1_i32_14 : i32
    %c8_i32 = arith.constant 8 : i32
    %42 = arith.muli %41, %c8_i32 : i32
    %c0_i32_15 = arith.constant 0 : i32
    %43 = arith.cmpi sgt, %42, %c0_i32_15 : i32
    %44 = arith.extui %43 : i1 to i32
    %c0_i32_16 = arith.constant 0 : i32
    %45 = arith.cmpi ne, %44, %c0_i32_16 : i32
    scf.if %45 {
      %c8_i32_18 = arith.constant 8 : i32
      %49 = arith.muli %40, %c8_i32_18 : i32
      %50 = tpu.iota {dimensions = array<i32: 0>} : vector<8x128xi32>
      %51 = vector.broadcast %49 : i32 to vector<8x128xi32>
      %52 = arith.addi %51, %50 : vector<8x128xi32>
      %53 = tpu.iota {dimensions = array<i32: 1>} : vector<8x128xi32>
      %c0_i32_19 = arith.constant 0 : i32
      %54 = vector.broadcast %c0_i32_19 : i32 to vector<8x128xi32>
      %55 = arith.cmpi slt, %52, %54 : vector<8x128xi32>
      %c0_i32_20 = arith.constant 0 : i32
      %56 = vector.broadcast %c0_i32_20 : i32 to vector<8x128xi32>
      %57 = arith.cmpi eq, %52, %56 : vector<8x128xi32>
      %c8_i32_21 = arith.constant 8 : i32
      %58 = vector.broadcast %c8_i32_21 : i32 to vector<8x128xi32>
      %59 = arith.cmpi slt, %53, %58 : vector<8x128xi32>
      %60 = arith.andi %57, %59 : vector<8x128xi1>
      %61 = arith.ori %55, %60 : vector<8x128xi1>
      %cst_22 = arith.constant 0.000000e+00 : f32
      %62 = vector.broadcast %cst_22 : f32 to vector<8x128xf32>
      %63 = arith.select %61, %38, %62 : vector<8x128xi1>, vector<8x128xf32>
      %c0_23 = arith.constant 0 : index
      %c0_24 = arith.constant 0 : index
      %64 = vector.load %arg4[%c0_23, %c0_24] : memref<8x128xf32, #tpu.memory_space<vmem>>, vector<8x128xf32>
      %65 = vector.shape_cast %63 : vector<8x128xf32> to vector<1x8x128xf32>
      %cst_25 = arith.constant dense<0.000000e+00> : vector<8x128xf32>
      %66 = vector.multi_reduction <add>, %65, %cst_25 [0] : vector<1x8x128xf32> to vector<8x128xf32>
      %67 = arith.addf %64, %66 : vector<8x128xf32>
      %c0_26 = arith.constant 0 : index
      %c0_27 = arith.constant 0 : index
      %68 = vector.load %arg4[%c0_26, %c0_27] : memref<8x128xf32, #tpu.memory_space<vmem>>, vector<8x128xf32>
      tpu.vector_store %arg4[%c0_26, %c0_27], %67 {strides = array<i32>} : memref<8x128xf32, #tpu.memory_space<vmem>>, vector<8x128xf32>,
    } else {
    }
    %true = arith.constant true
    %46 = arith.xori %43, %true : i1
    %47 = arith.extui %46 : i1 to i32
    %c0_i32_17 = arith.constant 0 : i32
    %48 = arith.cmpi ne, %47, %c0_i32_17 : i32
    scf.if %48 {
      %c0_18 = arith.constant 0 : index
      %c0_19 = arith.constant 0 : index
      %49 = vector.load %arg4[%c0_18, %c0_19] : memref<8x128xf32, #tpu.memory_space<vmem>>, vector<8x128xf32>
      %50 = vector.shape_cast %38 : vector<8x128xf32> to vector<1x8x128xf32>
      %cst_20 = arith.constant dense<0.000000e+00> : vector<8x128xf32>
      %51 = vector.multi_reduction <add>, %50, %cst_20 [0] : vector<1x8x128xf32> to vector<8x128xf32>
      %52 = arith.addf %49, %51 : vector<8x128xf32>
      %c0_21 = arith.constant 0 : index
      %c0_22 = arith.constant 0 : index
      %53 = vector.load %arg4[%c0_21, %c0_22] : memref<8x128xf32, #tpu.memory_space<vmem>>, vector<8x128xf32>
      tpu.vector_store %arg4[%c0_21, %c0_22], %52 {strides = array<i32>} : memref<8x128xf32, #tpu.memory_space<vmem>>, vector<8x128xf32>,
    } else {
    }
    return
  }
  func.func @transform_0(%arg0: i32, %arg1: i32) -> (i32, i32) {
    %c1_i32 = arith.constant 1 : i32
    %0 = arith.muli %arg0, %c1_i32 : i32
    %1 = arith.addi %0, %arg1 : i32
    %c0_i32 = arith.constant 0 : i32
    %c0_i32_0 = arith.constant 0 : i32
    return %1, %c0_i32 : i32, i32
  }
  func.func @transform_1(%arg0: i32, %arg1: i32) -> (i32, i32) {
    %c1_i32 = arith.constant 1 : i32
    %0 = arith.muli %arg0, %c1_i32 : i32
    %1 = arith.addi %0, %arg1 : i32
    %c0_i32 = arith.constant 0 : i32
    %c0_i32_0 = arith.constant 0 : i32
    return %1, %c0_i32 : i32, i32
  }
  func.func @transform_2(%arg0: i32, %arg1: i32) -> (i32, i32) {
    %c0_i32 = arith.constant 0 : i32
    %c0_i32_0 = arith.constant 0 : i32
    return %arg0, %c0_i32 : i32, i32
  }
}

</mosaic_0001>

<bundles_post_ra>
// kernel: tpu_custom_call.1
= control target key start
LH: loop header
LB: loop body
LE: loop exit
PB: predicated region body
PF: predicated region fallthrough
CT: control target
= control target key end

     0   :  { %7 = vsyncpa [#allocation3], 0  ;;  %s240_s0 = inlined_call_operand.hbm [shape: f32[8,128], index: 0, kind: input, shape index: {}]   ;;  %s241_s1 = inlined_call_operand.hbm [shape: f32[8,128], index: 1, kind: input, shape index: {}]   ;;  %s242_s2 = inlined_call_operand.hbm [shape: f32[8,128], index: 2, kind: output, shape index: {}]  }
   0x1   :  { %8 = vsyncpa [#allocation6], 0 }
   0x2   :  { %9 = vsyncpa [#allocation4], 0  ;;  %s18_s11 = sshll.u32 %s240_s0, 4  ;;  %s213_s12 = smov [#allocation2]   ;;  %s19_s11 = int_to_ptr.hbm [resolvable:$true] %s18_s11 }
   0x3   :  { %s20_s13 = sshll.u32 %s213_s12, 4  ;;  %s32_s16 = sshll.u32 %s241_s1, 4  ;;  %s21_s13 = int_to_ptr.vmem [resolvable:$true] %s20_s13  ;;  %s33_s16 = int_to_ptr.hbm [resolvable:$true] %s32_s16 }
   0x4   :  { %23 = dma.hbm_to_vmem [thread:$0]  %s19_s11, 128, %s21_s13, [#allocation3]  }
   0x5   :  { %s214_s17 = smov [#allocation5]  }
   0x6   :  { %s34_s18 = sshll.u32 %s214_s17, 4  ;;  %s35_s18 = int_to_ptr.vmem [resolvable:$true] %s34_s18 }
   0x7   :  { %37 = dma.hbm_to_vmem [thread:$0]  %s33_s16, 128, %s35_s18, [#allocation6]  }
   0x8   :  { %207 = dma.done.wait [#allocation3], 128  }
   0x9   :  { %208 = vsyncadd [#allocation3], 4294967168 }
   0xa   :  { %209 = dma.done.wait [#allocation6], 128  }
   0xb   :  { %210 = vsyncadd [#allocation6], 4294967168  ;;  %v53_v0 = vld [vmem:[#allocation2] sm:$0xff]  ;;  %v54_v1 = vld [vmem:[#allocation5] sm:$0xff]  ;;  %v85_v9 = vlaneseq  ;;  %s215_s0 = smov [#allocation7]   ;;  %s116_s21 = sshll.u32 %s242_s2, 4  ;;  %s117_s21 = int_to_ptr.hbm [resolvable:$true] %s116_s21 }
   0xc   :  { %v55_v2 = vmax.f32 %v53_v0, 1e-06  ;;  %v59_v4 = vsub.f32 1.0, %v54_v1  ;;  %v72_v10 = vmul.f32 0.25, %v54_v1  ;;  %s114_s1 = sshll.u32 %s215_s0, 4  ;;  %s115_s1 = int_to_ptr.vmem [resolvable:$true] %s114_s1 }
   0xd   :  { %v86_v16 = vshrl.u32 %v85_v9, 7  ;;  %v90_v17 = vand.u32 127, %v85_v9 }
   0xe   :  { %v56_v3 = vmin.f32 %v55_v2, 0.999999  ;;  %v73_v11 = vmul.f32 0.75, %v59_v4 }
   0xf   :  { %vm92_vm0 = vcmp.eq.s32.totalorder %v86_v16, 0  ;;  %vm93_vm1 = vcmp.lt.s32.totalorder %v90_v17, 8 }
  0x10   :  { %v57_v5 = vmul.f32 %v56_v3, %v54_v1  ;;  %v58_v6 = vsub.f32 1.0, %v56_v3  ;;  %131 = vlog2.f32 %v56_v3  ;;  %v74_v21 = vadd.f32 %v73_v11, %v72_v10  ;;  %vm94_vm2 = vmand %vm92_vm0, %vm93_vm1 }
  0x12   :  { %v60_v7 = vmul.f32 %v59_v4, %v58_v6  ;;  %133 = vlog2.f32 %v58_v6 }
  0x14   :  { %v61_v8 = vadd.f32 %v60_v7, %v57_v5 }
  0x16   :  { %v132_v12 = vpop.eup %131  ;;  %v62_v13 = vsub.f32 1.0, %v61_v8 }
  0x17   :  { %v64_v14 = vmul.f32 0.6931472, %v132_v12 }
  0x18   :  { %v134_v15 = vpop.eup %133  ;;  %v71_v20 = vmul.f32 %v62_v13, %v62_v13 }
  0x19   :  { %v65_v18 = vmul.f32 %v64_v14, %v54_v1  ;;  %v67_v19 = vmul.f32 0.6931472, %v134_v15 }
  0x1a   :  { %v75_v24 = vmul.f32 %v74_v21, %v71_v20 }
  0x1b   :  { %v68_v22 = vmul.f32 %v67_v19, %v59_v4 }
  0x1d   :  { %v69_v23 = vadd.f32 %v68_v22, %v65_v18 }
  0x1f   :  { %v70_v25 = vsub.f32 0.0, %v69_v23 }
  0x21   :  { %v76_v26 = vmul.f32 %v75_v24, %v70_v25 }
  0x23   :  { %v96_v27 = vsel %vm94_vm2, %v76_v26, 0.0 }
  0x24   :  { %100 = vst [vmem:[#allocation7] sm:$0xff] %v96_v27 }
  0x25   :  { %119 = dma.vmem_to_hbm [thread:$0]  %s115_s1, 128, %s117_s21, [#allocation4]  }
  0x26   :  { %211 = dma.done.wait [#allocation4], 128  }
  0x27   :  { %212 = vsyncadd [#allocation4], 4294967168 }
  0x28   :  { %124 = vsyncpa [#allocation3], 1 }
  0x29   :  { %125 = vsyncpa [#allocation6], 1 }
  0x2a   :  { %126 = vsyncpa [#allocation4], 1 }

</bundles_post_ra>
